<compile_context>
chip_gen: v6e
topology: v6e:2x2x1
jax: 0.10.0
libtpu: 0.0.40
codegen_flags: <defaults>
</compile_context>

<pallas_src>
import jax
import jax.numpy as jnp
from jax.experimental import pallas as pl
from jax.experimental.pallas import tpu as pltpu

_EPS = 1e-5


def _sigmoid(x):
    # EUP tanh form: numerically safe, no exp overflow for very negative x.
    return 0.5 * (jnp.tanh(0.5 * x) + 1.0)


def _bn_cols(h, gamma, beta):
    """BatchNorm1d on a feature-major (F, B) block: batch stats, biased var."""
    m = jnp.mean(h, axis=1, keepdims=True)
    d = h - m
    v = jnp.mean(d * d, axis=1, keepdims=True)
    return d * jax.lax.rsqrt(v + _EPS) * gamma + beta


def encoder_cell_kernel(
    xcol_ref,    # (C_in*K, N)    bf16  im2col input, N = B*L_out (b-major cols)
    w_ref,       # (C_out, C_in*K) bf16 conv weight
    bconv_ref,   # (C_out, 1)      f32  conv bias
    # APReLU.fcn params (torch (out,in) orientation; fc1 split into pos/neg halves)
    w1p_ref, w1n_ref, b1_ref, g1_ref, bt1_ref,
    w2_ref, b2_ref, g2_ref, bt2_ref,
    # EncoderCell.bn
    bng_ref, bnb_ref,
    # constant segment matrices (built in the wrapper)
    smean_ref,   # (N, B)  1/L_out inside each batch segment -> mean over L
    pexp_ref,    # (B, N)  1 inside each batch segment       -> broadcast over L
    o_ref,       # (C_out, N) f32
):
    # ---------------- Conv1d: one MXU contraction (bf16 in, f32 acc) --------
    y = jnp.dot(w_ref[...], xcol_ref[...],
                preferred_element_type=jnp.float32) + bconv_ref[...]   # (C, N)

    # ---------------- APReLU -------------------------------------------------
    pos = jnp.maximum(y, 0.0)
    neg = y - pos                                              # == min(y, 0)

    # GAP over L per (channel, batch) via the segment-mean matrix.
    gp = jnp.dot(pos, smean_ref[...], preferred_element_type=jnp.float32)  # (C, B)
    gn = jnp.dot(neg, smean_ref[...], preferred_element_type=jnp.float32)  # (C, B)

    # fcn, feature-major: Linear -> BN(batch) -> ReLU -> Linear -> BN -> Sigmoid
    h = (jnp.dot(w1p_ref[...], gp, preferred_element_type=jnp.float32)
         + jnp.dot(w1n_ref[...], gn, preferred_element_type=jnp.float32)
         + b1_ref[...])
    h = _bn_cols(h, g1_ref[...], bt1_ref[...])
    h = jnp.maximum(h, 0.0)
    h = jnp.dot(w2_ref[...], h, preferred_element_type=jnp.float32) + b2_ref[...]
    h = _bn_cols(h, g2_ref[...], bt2_ref[...])
    scale = _sigmoid(h)                                        # (C, B)

    # Broadcast the per-(c,b) scale back over L and combine.
    scale_cols = jnp.dot(scale, pexp_ref[...],
                         preferred_element_type=jnp.float32)   # (C, N)
    xa = pos + scale_cols * neg

    # --------- BatchNorm1d over (B, L) per channel, batch statistics --------
    m = jnp.mean(xa, axis=1, keepdims=True)                    # (C, 1)
    d = xa - m
    v = jnp.mean(d * d, axis=1, keepdims=True)
    o_ref[...] = (d * jax.lax.rsqrt(v + _EPS) * bng_ref[...]
                  + bnb_ref[...]).astype(o_ref.dtype)


def encoder_cell_forward(x, params, *, out_channels, kernel_size, padding,
                         stride=2):
    B, C_in, L = x.shape
    K = kernel_size
    C = out_channels
    L_out = (L + 2 * padding - K) // stride + 1
    N = B * L_out

    # ---- glue: im2col with B folded into the lane axis ----------------------
    x_p = jnp.pad(x, ((0, 0), (0, 0), (padding, padding)))
    cols = jnp.stack(
        [x_p[:, :, k:k + stride * (L_out - 1) + 1:stride] for k in range(K)],
        axis=2)                                   # (B, C_in, K, L_out)
    xcol = cols.transpose(1, 2, 0, 3).reshape(C_in * K, N)     # (ci*K+k, b*L+t)
    w2d = params["conv_w"].reshape(C, C_in * K)

    # bf16 matmul operands (f32 accumulation happens in the kernel).
    xcol = xcol.astype(jnp.bfloat16)
    w2d = w2d.astype(jnp.bfloat16)

    # ---- glue: per-batch segment matrices (columns are b-major) -------------
    eye_b = jnp.eye(B, dtype=jnp.float32)
    pexp = jnp.repeat(eye_b, L_out, axis=1)        # (B, N) ones per segment
    smean = pexp.T / jnp.float32(L_out)            # (N, B) mean-over-L matrix

    col = lambda a: a.reshape(-1, 1)
    args = (
        xcol, w2d, col(params["conv_b"]),
        params["fc1_w"][:, :C], params["fc1_w"][:, C:], col(params["fc1_b"]),
        col(params["bn1_g"]), col(params["bn1_b"]),
        params["fc2_w"], col(params["fc2_b"]),
        col(params["bn2_g"]), col(params["bn2_b"]),
        col(params["bn_g"]), col(params["bn_b"]),
        smean, pexp,
    )

    vmem = pl.BlockSpec(memory_space=pltpu.MemorySpace.VMEM)
    out2d = pl.pallas_call(
        encoder_cell_kernel,
        out_shape=jax.ShapeDtypeStruct((C, N), jnp.float32),
        in_specs=[vmem] * len(args),
        out_specs=vmem,
        compiler_params=pltpu.CompilerParams(vmem_limit_bytes=64 * 1024 * 1024),
    )(*args)

    # Layout plumbing back to the module's (B, C, L_out) convention.
    return out2d.reshape(C, B, L_out).transpose(1, 0, 2)


def init_params(key, c_in, c_out, k_size):
    ks = jax.random.split(key, 12)

    def n(i, shape, s=0.2):
        return s * jax.random.normal(ks[i], shape, jnp.float32)

    c2 = 2 * c_out
    return dict(
        conv_w=n(0, (c_out, c_in, k_size)),          # torch Conv1d (C_out,C_in,K)
        conv_b=n(1, (c_out,), 0.1),
        # APReLU.fcn  (torch Linear layout: (out_features, in_features))
        fc1_w=n(2, (c2, c2)), fc1_b=n(3, (c2,), 0.1),
        bn1_g=1.0 + n(4, (c2,), 0.1), bn1_b=n(5, (c2,), 0.1),
        fc2_w=n(6, (c_out, c2)), fc2_b=n(7, (c_out,), 0.1),
        bn2_g=1.0 + n(8, (c_out,), 0.1), bn2_b=n(9, (c_out,), 0.1),
        # EncoderCell.bn
        bn_g=1.0 + n(10, (c_out,), 0.1), bn_b=n(11, (c_out,), 0.1),
    )


if __name__ == "__main__":
    key = jax.random.PRNGKey(0)
    k_x, k_p = jax.random.split(key)

    B, C_in, L = 2, 4, 16
    out_channels, kernel_size, padding, stride = 4, 4, 1, 2

    x = jax.random.normal(k_x, (B, C_in, L), jnp.float32)
    params = init_params(k_p, C_in, out_channels, kernel_size)

    out = encoder_cell_forward(
        x, params, out_channels=out_channels, kernel_size=kernel_size,
        padding=padding, stride=stride)
    out = jax.block_until_ready(out)

    L_out = (L + 2 * padding - kernel_size) // stride + 1
    assert out.shape == (B, out_channels, L_out), out.shape
    assert bool(jnp.all(jnp.isfinite(out)))
    print("KERNEL_OK")
</pallas_src>

<mosaic_0001>
module attributes {stable_mosaic.version = 11 : i64} {
  func.func @encoder_cell_kernel(%arg0: memref<16x16xbf16, #tpu.memory_space<vmem>>, %arg1: memref<4x16xbf16, #tpu.memory_space<vmem>>, %arg2: memref<4x1xf32, #tpu.memory_space<vmem>>, %arg3: memref<8x4xf32, #tpu.memory_space<vmem>>, %arg4: memref<8x4xf32, #tpu.memory_space<vmem>>, %arg5: memref<8x1xf32, #tpu.memory_space<vmem>>, %arg6: memref<8x1xf32, #tpu.memory_space<vmem>>, %arg7: memref<8x1xf32, #tpu.memory_space<vmem>>, %arg8: memref<4x8xf32, #tpu.memory_space<vmem>>, %arg9: memref<4x1xf32, #tpu.memory_space<vmem>>, %arg10: memref<4x1xf32, #tpu.memory_space<vmem>>, %arg11: memref<4x1xf32, #tpu.memory_space<vmem>>, %arg12: memref<4x1xf32, #tpu.memory_space<vmem>>, %arg13: memref<4x1xf32, #tpu.memory_space<vmem>>, %arg14: memref<16x2xf32, #tpu.memory_space<vmem>>, %arg15: memref<2x16xf32, #tpu.memory_space<vmem>>, %arg16: memref<4x16xf32, #tpu.memory_space<vmem>>) attributes {dimension_semantics = [], scalar_prefetch = 0 : i64, scratch_operands = 0 : i64, tpu.core_type = #tpu.core_type<tc>} {
    %c0 = arith.constant 0 : index
    %c0_0 = arith.constant 0 : index
    %0 = vector.load %arg1[%c0, %c0_0] : memref<4x16xbf16, #tpu.memory_space<vmem>>, vector<4x16xbf16>
    %c0_1 = arith.constant 0 : index
    %c0_2 = arith.constant 0 : index
    %1 = vector.load %arg0[%c0_1, %c0_2] : memref<16x16xbf16, #tpu.memory_space<vmem>>, vector<16x16xbf16>
    %cst = arith.constant dense<0.000000e+00> : vector<4x16xf32>
    %2 = tpu.matmul %0, %1, %cst {dimension_numbers = #tpu.dot_dimension_numbers<[1], [0], [0], [1], [0, 0, 1, 1], [], []>} : vector<4x16xbf16>, vector<16x16xbf16>, vector<4x16xf32> -> vector<4x16xf32>
    %c0_3 = arith.constant 0 : index
    %c0_4 = arith.constant 0 : index
    %3 = vector.load %arg2[%c0_3, %c0_4] : memref<4x1xf32, #tpu.memory_space<vmem>>, vector<4x1xf32>
    %4 = vector.broadcast %3 : vector<4x1xf32> to vector<4x16xf32>
    %5 = arith.addf %2, %4 : vector<4x16xf32>
    %cst_5 = arith.constant 0.000000e+00 : f32
    %6 = vector.broadcast %cst_5 : f32 to vector<4x16xf32>
    %7 = arith.maximumf %5, %6 : vector<4x16xf32>
    %8 = arith.subf %5, %7 : vector<4x16xf32>
    %c0_6 = arith.constant 0 : index
    %c0_7 = arith.constant 0 : index
    %9 = vector.load %arg14[%c0_6, %c0_7] : memref<16x2xf32, #tpu.memory_space<vmem>>, vector<16x2xf32>
    %cst_8 = arith.constant dense<0.000000e+00> : vector<4x2xf32>
    %10 = tpu.matmul %7, %9, %cst_8 {dimension_numbers = #tpu.dot_dimension_numbers<[1], [0], [0], [1], [0, 0, 1, 1], [], []>} : vector<4x16xf32>, vector<16x2xf32>, vector<4x2xf32> -> vector<4x2xf32>
    %c0_9 = arith.constant 0 : index
    %c0_10 = arith.constant 0 : index
    %11 = vector.load %arg14[%c0_9, %c0_10] : memref<16x2xf32, #tpu.memory_space<vmem>>, vector<16x2xf32>
    %cst_11 = arith.constant dense<0.000000e+00> : vector<4x2xf32>
    %12 = tpu.matmul %8, %11, %cst_11 {dimension_numbers = #tpu.dot_dimension_numbers<[1], [0], [0], [1], [0, 0, 1, 1], [], []>} : vector<4x16xf32>, vector<16x2xf32>, vector<4x2xf32> -> vector<4x2xf32>
    %c0_12 = arith.constant 0 : index
    %c0_13 = arith.constant 0 : index
    %13 = vector.load %arg3[%c0_12, %c0_13] : memref<8x4xf32, #tpu.memory_space<vmem>>, vector<8x4xf32>
    %cst_14 = arith.constant dense<0.000000e+00> : vector<8x2xf32>
    %14 = tpu.matmul %13, %10, %cst_14 {dimension_numbers = #tpu.dot_dimension_numbers<[1], [0], [0], [1], [0, 0, 1, 1], [], []>} : vector<8x4xf32>, vector<4x2xf32>, vector<8x2xf32> -> vector<8x2xf32>
    %c0_15 = arith.constant 0 : index
    %c0_16 = arith.constant 0 : index
    %15 = vector.load %arg4[%c0_15, %c0_16] : memref<8x4xf32, #tpu.memory_space<vmem>>, vector<8x4xf32>
    %cst_17 = arith.constant dense<0.000000e+00> : vector<8x2xf32>
    %16 = tpu.matmul %15, %12, %cst_17 {dimension_numbers = #tpu.dot_dimension_numbers<[1], [0], [0], [1], [0, 0, 1, 1], [], []>} : vector<8x4xf32>, vector<4x2xf32>, vector<8x2xf32> -> vector<8x2xf32>
    %17 = arith.addf %14, %16 : vector<8x2xf32>
    %c0_18 = arith.constant 0 : index
    %c0_19 = arith.constant 0 : index
    %18 = vector.load %arg5[%c0_18, %c0_19] : memref<8x1xf32, #tpu.memory_space<vmem>>, vector<8x1xf32>
    %19 = vector.broadcast %18 : vector<8x1xf32> to vector<8x2xf32>
    %20 = arith.addf %17, %19 : vector<8x2xf32>
    %c0_20 = arith.constant 0 : index
    %c0_21 = arith.constant 0 : index
    %21 = vector.load %arg6[%c0_20, %c0_21] : memref<8x1xf32, #tpu.memory_space<vmem>>, vector<8x1xf32>
    %c0_22 = arith.constant 0 : index
    %c0_23 = arith.constant 0 : index
    %22 = vector.load %arg7[%c0_22, %c0_23] : memref<8x1xf32, #tpu.memory_space<vmem>>, vector<8x1xf32>
    %cst_24 = arith.constant dense<0.000000e+00> : vector<8xf32>
    %23 = vector.multi_reduction <add>, %20, %cst_24 [1] : vector<8x2xf32> to vector<8xf32>
    %24 = vector.shape_cast %23 : vector<8xf32> to vector<8x1xf32>
    %cst_25 = arith.constant 2.000000e+00 : f32
    %25 = vector.broadcast %cst_25 : f32 to vector<8x1xf32>
    %26 = arith.divf %24, %25 : vector<8x1xf32>
    %27 = vector.broadcast %26 : vector<8x1xf32> to vector<8x2xf32>
    %28 = arith.subf %20, %27 : vector<8x2xf32>
    %29 = arith.mulf %28, %28 : vector<8x2xf32>
    %cst_26 = arith.constant dense<0.000000e+00> : vector<8xf32>
    %30 = vector.multi_reduction <add>, %29, %cst_26 [1] : vector<8x2xf32> to vector<8xf32>
    %31 = vector.shape_cast %30 : vector<8xf32> to vector<8x1xf32>
    %cst_27 = arith.constant 2.000000e+00 : f32
    %32 = vector.broadcast %cst_27 : f32 to vector<8x1xf32>
    %33 = arith.divf %31, %32 : vector<8x1xf32>
    %cst_28 = arith.constant 9.99999974E-6 : f32
    %34 = vector.broadcast %cst_28 : f32 to vector<8x1xf32>
    %35 = arith.addf %33, %34 : vector<8x1xf32>
    %36 = math.rsqrt %35 : vector<8x1xf32>
    %37 = vector.broadcast %36 : vector<8x1xf32> to vector<8x2xf32>
    %38 = arith.mulf %28, %37 : vector<8x2xf32>
    %39 = vector.broadcast %21 : vector<8x1xf32> to vector<8x2xf32>
    %40 = arith.mulf %38, %39 : vector<8x2xf32>
    %41 = vector.broadcast %22 : vector<8x1xf32> to vector<8x2xf32>
    %42 = arith.addf %40, %41 : vector<8x2xf32>
    %cst_29 = arith.constant 0.000000e+00 : f32
    %43 = vector.broadcast %cst_29 : f32 to vector<8x2xf32>
    %44 = arith.maximumf %42, %43 : vector<8x2xf32>
    %c0_30 = arith.constant 0 : index
    %c0_31 = arith.constant 0 : index
    %45 = vector.load %arg8[%c0_30, %c0_31] : memref<4x8xf32, #tpu.memory_space<vmem>>, vector<4x8xf32>
    %cst_32 = arith.constant dense<0.000000e+00> : vector<4x2xf32>
    %46 = tpu.matmul %45, %44, %cst_32 {dimension_numbers = #tpu.dot_dimension_numbers<[1], [0], [0], [1], [0, 0, 1, 1], [], []>} : vector<4x8xf32>, vector<8x2xf32>, vector<4x2xf32> -> vector<4x2xf32>
    %c0_33 = arith.constant 0 : index
    %c0_34 = arith.constant 0 : index
    %47 = vector.load %arg9[%c0_33, %c0_34] : memref<4x1xf32, #tpu.memory_space<vmem>>, vector<4x1xf32>
    %48 = vector.broadcast %47 : vector<4x1xf32> to vector<4x2xf32>
    %49 = arith.addf %46, %48 : vector<4x2xf32>
    %c0_35 = arith.constant 0 : index
    %c0_36 = arith.constant 0 : index
    %50 = vector.load %arg10[%c0_35, %c0_36] : memref<4x1xf32, #tpu.memory_space<vmem>>, vector<4x1xf32>
    %c0_37 = arith.constant 0 : index
    %c0_38 = arith.constant 0 : index
    %51 = vector.load %arg11[%c0_37, %c0_38] : memref<4x1xf32, #tpu.memory_space<vmem>>, vector<4x1xf32>
    %cst_39 = arith.constant dense<0.000000e+00> : vector<4xf32>
    %52 = vector.multi_reduction <add>, %49, %cst_39 [1] : vector<4x2xf32> to vector<4xf32>
    %53 = vector.shape_cast %52 : vector<4xf32> to vector<4x1xf32>
    %cst_40 = arith.constant 2.000000e+00 : f32
    %54 = vector.broadcast %cst_40 : f32 to vector<4x1xf32>
    %55 = arith.divf %53, %54 : vector<4x1xf32>
    %56 = vector.broadcast %55 : vector<4x1xf32> to vector<4x2xf32>
    %57 = arith.subf %49, %56 : vector<4x2xf32>
    %58 = arith.mulf %57, %57 : vector<4x2xf32>
    %cst_41 = arith.constant dense<0.000000e+00> : vector<4xf32>
    %59 = vector.multi_reduction <add>, %58, %cst_41 [1] : vector<4x2xf32> to vector<4xf32>
    %60 = vector.shape_cast %59 : vector<4xf32> to vector<4x1xf32>
    %cst_42 = arith.constant 2.000000e+00 : f32
    %61 = vector.broadcast %cst_42 : f32 to vector<4x1xf32>
    %62 = arith.divf %60, %61 : vector<4x1xf32>
    %cst_43 = arith.constant 9.99999974E-6 : f32
    %63 = vector.broadcast %cst_43 : f32 to vector<4x1xf32>
    %64 = arith.addf %62, %63 : vector<4x1xf32>
    %65 = math.rsqrt %64 : vector<4x1xf32>
    %66 = vector.broadcast %65 : vector<4x1xf32> to vector<4x2xf32>
    %67 = arith.mulf %57, %66 : vector<4x2xf32>
    %68 = vector.broadcast %50 : vector<4x1xf32> to vector<4x2xf32>
    %69 = arith.mulf %67, %68 : vector<4x2xf32>
    %70 = vector.broadcast %51 : vector<4x1xf32> to vector<4x2xf32>
    %71 = arith.addf %69, %70 : vector<4x2xf32>
    %cst_44 = arith.constant 5.000000e-01 : f32
    %72 = vector.broadcast %cst_44 : f32 to vector<4x2xf32>
    %73 = arith.mulf %72, %71 : vector<4x2xf32>
    %74 = math.tanh %73 : vector<4x2xf32>
    %cst_45 = arith.constant 1.000000e+00 : f32
    %75 = vector.broadcast %cst_45 : f32 to vector<4x2xf32>
    %76 = arith.addf %74, %75 : vector<4x2xf32>
    %cst_46 = arith.constant 5.000000e-01 : f32
    %77 = vector.broadcast %cst_46 : f32 to vector<4x2xf32>
    %78 = arith.mulf %77, %76 : vector<4x2xf32>
    %c0_47 = arith.constant 0 : index
    %c0_48 = arith.constant 0 : index
    %79 = vector.load %arg15[%c0_47, %c0_48] : memref<2x16xf32, #tpu.memory_space<vmem>>, vector<2x16xf32>
    %cst_49 = arith.constant dense<0.000000e+00> : vector<4x16xf32>
    %80 = tpu.matmul %78, %79, %cst_49 {dimension_numbers = #tpu.dot_dimension_numbers<[1], [0], [0], [1], [0, 0, 1, 1], [], []>} : vector<4x2xf32>, vector<2x16xf32>, vector<4x16xf32> -> vector<4x16xf32>
    %81 = arith.mulf %80, %8 : vector<4x16xf32>
    %82 = arith.addf %7, %81 : vector<4x16xf32>
    %cst_50 = arith.constant dense<0.000000e+00> : vector<4xf32>
    %83 = vector.multi_reduction <add>, %82, %cst_50 [1] : vector<4x16xf32> to vector<4xf32>
    %84 = vector.shape_cast %83 : vector<4xf32> to vector<4x1xf32>
    %cst_51 = arith.constant 1.600000e+01 : f32
    %85 = vector.broadcast %cst_51 : f32 to vector<4x1xf32>
    %86 = arith.divf %84, %85 : vector<4x1xf32>
    %87 = vector.broadcast %86 : vector<4x1xf32> to vector<4x16xf32>
    %88 = arith.subf %82, %87 : vector<4x16xf32>
    %89 = arith.mulf %88, %88 : vector<4x16xf32>
    %cst_52 = arith.constant dense<0.000000e+00> : vector<4xf32>
    %90 = vector.multi_reduction <add>, %89, %cst_52 [1] : vector<4x16xf32> to vector<4xf32>
    %91 = vector.shape_cast %90 : vector<4xf32> to vector<4x1xf32>
    %cst_53 = arith.constant 1.600000e+01 : f32
    %92 = vector.broadcast %cst_53 : f32 to vector<4x1xf32>
    %93 = arith.divf %91, %92 : vector<4x1xf32>
    %cst_54 = arith.constant 9.99999974E-6 : f32
    %94 = vector.broadcast %cst_54 : f32 to vector<4x1xf32>
    %95 = arith.addf %93, %94 : vector<4x1xf32>
    %96 = math.rsqrt %95 : vector<4x1xf32>
    %97 = vector.broadcast %96 : vector<4x1xf32> to vector<4x16xf32>
    %98 = arith.mulf %88, %97 : vector<4x16xf32>
    %c0_55 = arith.constant 0 : index
    %c0_56 = arith.constant 0 : index
    %99 = vector.load %arg12[%c0_55, %c0_56] : memref<4x1xf32, #tpu.memory_space<vmem>>, vector<4x1xf32>
    %100 = vector.broadcast %99 : vector<4x1xf32> to vector<4x16xf32>
    %101 = arith.mulf %98, %100 : vector<4x16xf32>
    %c0_57 = arith.constant 0 : index
    %c0_58 = arith.constant 0 : index
    %102 = vector.load %arg13[%c0_57, %c0_58] : memref<4x1xf32, #tpu.memory_space<vmem>>, vector<4x1xf32>
    %103 = vector.broadcast %102 : vector<4x1xf32> to vector<4x16xf32>
    %104 = arith.addf %101, %103 : vector<4x16xf32>
    %c0_59 = arith.constant 0 : index
    %c0_60 = arith.constant 0 : index
    %105 = vector.load %arg16[%c0_59, %c0_60] : memref<4x16xf32, #tpu.memory_space<vmem>>, vector<4x16xf32>
    tpu.vector_store %arg16[%c0_59, %c0_60], %104 {strides = array<i32>} : memref<4x16xf32, #tpu.memory_space<vmem>>, vector<4x16xf32>,
    return
  }
}

</mosaic_0001>

<bundles_post_ra>
// kernel: tpu_custom_call.1
= control target key start
LH: loop header
LB: loop body
LE: loop exit
PB: predicated region body
PF: predicated region fallthrough
CT: control target
= control target key end

     0   :  { %s966_s0 = inlined_call_operand.vmem [shape: bf16[16,16], index: 0, kind: input, shape index: {}]   ;;  %s967_s1 = inlined_call_operand.vmem [shape: bf16[4,16], index: 1, kind: input, shape index: {}]   ;;  %s968_s2 = inlined_call_operand.vmem [shape: f32[4,1], index: 2, kind: input, shape index: {}]   ;;  %s969_s3 = inlined_call_operand.vmem [shape: f32[8,4], index: 3, kind: input, shape index: {}]   ;;  %s970_s4 = inlined_call_operand.vmem [shape: f32[8,4], index: 4, kind: input, shape index: {}]   ;;  %s971_s5 = inlined_call_operand.vmem [shape: f32[8,1], index: 5, kind: input, shape index: {}]   ;;  %s972_s6 = inlined_call_operand.vmem [shape: f32[8,1], index: 6, kind: input, shape index: {}]   ;;  %s973_s7 = inlined_call_operand.vmem [shape: f32[8,1], index: 7, kind: input, shape index: {}]   ;;  %s974_s8 = inlined_call_operand.vmem [shape: f32[4,8], index: 8, kind: input, shape index: {}]   ;;  %s975_s9 = inlined_call_operand.vmem [shape: f32[4,1], index: 9, kind: input, shape index: {}]   ;;  %s976_s10 = inlined_call_operand.vmem [shape: f32[4,1], index: 10, kind: input, shape index: {}]   ;;  %s977_s11 = inlined_call_operand.vmem [shape: f32[4,1], index: 11, kind: input, shape index: {}]   ;;  %s978_s12 = inlined_call_operand.vmem [shape: f32[4,1], index: 12, kind: input, shape index: {}]   ;;  %s979_s13 = inlined_call_operand.vmem [shape: f32[4,1], index: 13, kind: input, shape index: {}]   ;;  %s980_s14 = inlined_call_operand.vmem [shape: f32[16,2], index: 14, kind: input, shape index: {}]   ;;  %s981_s15 = inlined_call_operand.vmem [shape: f32[2,16], index: 15, kind: input, shape index: {}]   ;;  %s982_s16 = inlined_call_operand.hbm [shape: f32[4,16], index: 16, kind: output, shape index: {}]  }
   0x1   :  { %983 = sst [smem:[#allocation5_spill]] %s966_s0 }
   0x2   :  { %s984_s23 = sld [smem:[#allocation5_spill]]  ;;  %v798_v1 = vmov 0.0   ;;  %vm799_vm0 = vmmov 0   ;;  %v55_v2 = vld [vmem:[%s967_s1] sm:$0x3]  ;;  %vm70_vm1 = vcmask 130048  }
   0x3   :  { %721 = vmatprep.subr.bf16.mxu0 %v798_v1  ;;  %727 = vmatprep.subr.mxu1 %v798_v1  ;;  %v58_v3 = vld [vmem:[%s968_s2] sm:$0xf]  ;;  %v800_v4 = vmov 0  }
   0x4   :  { %723 = vmatprep.mubr.msk.bf16.mxu0 %vm799_vm0, %v798_v1  ;;  %765 = vset.pattern.permute.xlu0 %v800_v4 }
   0x5   :  { %731 = vmatprep.mubr.msk.f32.mxu1 %vm799_vm0, %v798_v1 }
   0x8   :  { %v767_v0 = vld [vmem:[%s984_s23] sm:$0xff]  }
   0x9   :  { %722 = vmatpush3.bf16.msra.mxu0 %v767_v0 }
   0xa   :  { %21 = vsyncpa [#allocation3], 0  ;;  %61 = vperm.xlu0 %765, %v58_v3   ;;  %741 = vmatprep.subr.mxu0 %v798_v1  ;;  %v420_v5 = vld [vmem:[%s971_s5] sm:$0xff]  ;;  %v117_v8 = vld [vmem:[%s980_s14 + $0x8] sm:$0xff]  ;;  %vm270_vm2 = vcmask 1043456   ;;  %vm266_vm3 = vcmask 31744  }
   0xb   :  { %766 = vset.pattern.permute.xlu1 %v800_v4  ;;  %v427_v6 = vld [vmem:[%s972_s6] sm:$0xff]  ;;  %728 = vmatpush3.msra.mxu1 %v117_v8  ;;  %vm429_vm4 = vcmask 15360   ;;  %vm464_vm5 = vcmask 64512   ;;  %vm540_vm6 = vcmask 11264   ;;  %vm574_vm7 = vcmask 1041408  }
   0xc   :  { %724 = vmatmul.mubr.msk.bf16.vlgmr.msra.gmra.mxu0 %vm70_vm1, %v55_v2  ;;  %v458_v7 = vld [vmem:[%s975_s9] sm:$0xf]  ;;  %729 = vmatprep.subr.mxu1 %v798_v1  ;;  %vm650_vm8 = vcmask 125952  }
   0xd   :  { %743 = vmatprep.mubr.msk.f32.mxu0 %vm799_vm0, %v798_v1  ;;  %v116_v9 = vld [vmem:[%s980_s14] sm:$0xff] }
   0xe   :  { %423 = vperm.xlu0 %765, %v420_v5   ;;  %730 = vmatpush3.msra.mxu1 %v116_v9  ;;  %v264_v18 = vld [vmem:[%s969_s3] sm:$0xff] }
   0xf   :  { %734 = vmatprep.subr.mxu1 %v798_v1  ;;  %v265_v21 = vld [vmem:[%s970_s4] sm:$0xff] }
  0x10   :  { %v428_v37 = vld [vmem:[%s973_s7] sm:$0xff] }
  0x11   :  { %v457_v48 = vld [vmem:[%s974_s8] sm:$0xf] }
  0x12   :  { %446 = vperm.xlu0 %765, %v427_v6   ;;  %v538_v54 = vld [vmem:[%s976_s10] sm:$0xf] }
  0x13   :  { %v539_v60 = vld [vmem:[%s977_s11] sm:$0xf] }
  0x14   :  { %v570_v61 = vld [vmem:[%s981_s15] sm:$0x3] }
  0x16   :  { %461 = vperm.xlu0 %765, %v458_v7  }
  0x85   :  { %v62_v10 = vpop.permute.xlu0 %61 }
  0x89   :  { %v424_v28 = vpop.permute.xlu0 %423 }
  0x8d   :  { %v447_v43 = vpop.permute.xlu0 %446 }
  0x91   :  { %v462_v49 = vpop.permute.xlu0 %461 }
  0xcc   :  { %v108_v11 = vpop.f32.mrf.mxu0 }
  0xcd   :  { %v109_v12 = vadd.f32 %v108_v11, %v62_v10 }
  0xce   :  { %v725_v13 = vpop.f32.mrf.mxu0 }
  0xcf   :  { %v915_v14 = vmax.f32 %v109_v12, 0.0 }
  0xd0   :  { %v111_v15 = vpop.f32.mrf.mxu0 }
  0xd1   :  { %732 = vmatmul.mubr.msk.f32.vlgmr.msra.gmra.mxu1 %vm70_vm1, %v915_v14  ;;  %v921_v17 = vsub.f32 %v109_v12, %v915_v14 }
  0xd2   :  { %v726_v16 = vpop.f32.mrf.mxu0  ;;  %735 = vmatpush3.msra.mxu1 %v117_v8  ;;  %738 = vmatprep.mubr.msk.f32.mxu1 %vm799_vm0, %v798_v1 }
  0xd3   :  { %736 = vmatprep.subr.mxu1 %v798_v1 }
  0xd4   :  { %737 = vmatpush3.msra.mxu1 %v116_v9 }
  0xd5   :  { %739 = vmatmul.mubr.msk.f32.vlgmr.msra.gmra.mxu1 %vm70_vm1, %v921_v17  ;;  %746 = vmatprep.subr.mxu1 %v798_v1 }
  0xd6   :  { %748 = vmatprep.mubr.msk.f32.mxu1 %vm799_vm0, %v798_v1 }
 0x191   :  { %v187_v19 = vpop.f32.mrf.mxu1 }
 0x192   :  { %747 = vmatpush3.msk.msra.mxu1 %vm270_vm2, %v187_v19 }
 0x193   :  { %v733_v20 = vpop.f32.mrf.mxu1  ;;  %749 = vmatmul.mubr.msk.f32.vlgmr.msra.gmra.mxu1 %vm266_vm3, %v264_v18  ;;  %756 = vmatprep.subr.mxu1 %v798_v1  ;;  %v665_v18 = vld [vmem:[%s978_s12] sm:$0xf]  ;;  %s801_s12 = smov [#allocation2]  }
 0x194   :  { %758 = vmatprep.mubr.msk.f32.mxu1 %vm799_vm0, %v798_v1  ;;  %757 = vmatpush3.msk.msra.mxu1 %vm574_vm7, %v570_v61  ;;  %s686_s28 = sshll.u32 %s801_s12, 4  ;;  %s687_s28 = int_to_ptr.vmem [resolvable:$true] %s686_s28 }
 0x195   :  { %v260_v22 = vpop.f32.mrf.mxu1  ;;  %s776_s29 = scalar_lea.vmem %s687_s28, 64  ;;  %p781_p1 = scmp.lt.s32.totalorder %s687_s28, %s687_s28 }
 0x196   :  { %742 = vmatpush3.msk.msra.mxu0 %vm270_vm2, %v260_v22  ;;  %p777_p0 = scmp.ne.s32.totalorder %s687_s28, %s776_s29  ;;  %p782_p2 = scmp.lt.s32.totalorder %s776_s29, %s776_s29 }
 0x197   :  { %v740_v23 = vpop.f32.mrf.mxu1  ;;  %744 = vmatmul.mubr.msk.f32.vlgmr.msra.gmra.mxu0 %vm266_vm3, %v265_v21  ;;  %751 = vmatprep.subr.mxu0 %v798_v1 }
 0x198   :  { %753 = vmatprep.mubr.msk.f32.mxu0 %vm799_vm0, %v798_v1  ;;  %p783_p3 = por %p782_p2, %p781_p1 }
 0x19a   :  { %p784_p4 = pnand %p783_p3, %p777_p0 }
 0x253   :  { %v416_v24 = vpop.f32.mrf.mxu1 }
 0x255   :  { %v750_v25 = vpop.f32.mrf.mxu1 }
 0x257   :  { %v340_v26 = vpop.f32.mrf.mxu0 }
 0x258   :  { %v417_v27 = vadd.f32 %v416_v24, %v340_v26 }
 0x259   :  { %v745_v29 = vpop.f32.mrf.mxu0 }
 0x25a   :  { %v426_v30 = vadd.f32 %v424_v28, %v417_v27 }
 0x25c   :  { %v430_v31 = vsel %vm429_vm4, %v426_v30, 0.0 }
 0x25d   :  { %431 = vadd.xlane.f32.xlu1 %v430_v31 }
 0x2e6   :  { %v432_v32 = vpop.xlane.xlu1 %431 }
 0x2e7   :  { %v434_v33 = vmul.f32 0.5, %v432_v32 }
 0x2e9   :  { %v435_v34 = vsub.f32 %v426_v30, %v434_v33 }
 0x2eb   :  { %v436_v35 = vmul.f32 %v435_v34, %v435_v34 }
 0x2ed   :  { %v437_v36 = vsel %vm429_vm4, %v436_v35, 0.0 }
 0x2ee   :  { %438 = vadd.xlane.f32.xlu1 %v437_v36 }
 0x2ff   :  { %452 = vperm.xlu1 %766, %v428_v37  }
 0x377   :  { %v439_v38 = vpop.xlane.xlu1 %438 }
 0x378   :  { %v440_v39 = vmul.f32 0.5, %v439_v38 }
 0x37a   :  { %v441_v40 = vadd.f32 1e-05, %v440_v39 }
 0x37b   :  { %v453_v44 = vpop.permute.xlu1 %452 }
 0x37c   :  { %768 = vrsqrt.f32 %v441_v40 }
 0x389   :  { %v769_v41 = vpop.eup %768 }
 0x38a   :  { %v443_v42 = vmul.f32 %v769_v41, %v435_v34 }
 0x38c   :  { %v449_v45 = vmul.f32 %v447_v43, %v443_v42 }
 0x38e   :  { %v455_v46 = vadd.f32 %v453_v44, %v449_v45 }
 0x390   :  { %v456_v47 = vmax.f32 %v455_v46, 0.0 }
 0x392   :  { %752 = vmatpush3.msra.mxu0 %v456_v47 }
 0x393   :  { %754 = vmatmul.mubr.msk.f32.vlgmr.msra.gmra.mxu0 %vm464_vm5, %v457_v48 }
 0x453   :  { %v534_v50 = vpop.f32.mrf.mxu0 }
 0x454   :  { %v535_v51 = vadd.f32 %v534_v50, %v462_v49 }
 0x455   :  { %v755_v52 = vpop.f32.mrf.mxu0 }
 0x456   :  { %v541_v53 = vsel %vm540_vm6, %v535_v51, 0.0 }
 0x457   :  { %542 = vadd.xlane.f32.xlu0 %v541_v53 }
 0x46d   :  { %556 = vperm.xlu0 %765, %v538_v54  }
 0x4e0   :  { %v543_v55 = vpop.xlane.xlu0 %542 }
 0x4e1   :  { %v544_v56 = vmul.f32 0.5, %v543_v55 }
 0x4e3   :  { %v545_v57 = vsub.f32 %v535_v51, %v544_v56 }
 0x4e5   :  { %v546_v58 = vmul.f32 %v545_v57, %v545_v57 }
 0x4e7   :  { %v547_v59 = vsel %vm540_vm6, %v546_v58, 0.0 }
 0x4e8   :  { %548 = vadd.xlane.f32.xlu1 %v547_v59  ;;  %v557_v3 = vpop.permute.xlu0 %556 }
 0x4f9   :  { %562 = vperm.xlu1 %766, %v539_v60  }
 0x571   :  { %v549_v62 = vpop.xlane.xlu1 %548 }
 0x572   :  { %v550_v63 = vmul.f32 0.5, %v549_v62 }
 0x574   :  { %v551_v0 = vadd.f32 1e-05, %v550_v63 }
 0x575   :  { %v563_v5 = vpop.permute.xlu1 %562 }
 0x576   :  { %770 = vrsqrt.f32 %v551_v0 }
 0x583   :  { %v771_v1 = vpop.eup %770 }
 0x584   :  { %v553_v2 = vmul.f32 %v771_v1, %v545_v57 }
 0x586   :  { %v559_v4 = vmul.f32 %v557_v3, %v553_v2 }
 0x588   :  { %v565_v6 = vadd.f32 %v563_v5, %v559_v4 }
 0x58a   :  { %v566_v7 = vmul.f32 0.5, %v565_v6 }
 0x58c   :  { %772 = vtanh.f32 %v566_v7 }
 0x599   :  { %v773_v8 = vpop.eup %772 }
 0x59a   :  { %v568_v9 = vadd.f32 1.0, %v773_v8 }
 0x59c   :  { %v569_v10 = vmul.f32 0.5, %v568_v9 }
 0x59e   :  { %759 = vmatmul.mubr.msk.f32.vlgmr.msra.gmra.mxu1 %vm429_vm4, %v569_v10 }
 0x65e   :  { %v644_v11 = vpop.f32.mrf.mxu1 }
 0x65f   :  { %v648_v12 = vmul.f32 %v644_v11, %v921_v17  ;;  %v672_v17 = vld [vmem:[%s979_s13] sm:$0xf] }
 0x660   :  { %v760_v13 = vpop.f32.mrf.mxu1 }
 0x661   :  { %v649_v15 = vadd.f32 %v648_v12, %v915_v14 }
 0x663   :  { %v651_v16 = vsel %vm650_vm8, %v649_v15, 0.0 }
 0x664   :  { %652 = vadd.xlane.f32.xlu0 %v651_v16 }
 0x67a   :  { %668 = vperm.xlu0 %765, %v665_v18  }
 0x6ed   :  { %v653_v19 = vpop.xlane.xlu0 %652 }
 0x6ee   :  { %v655_v20 = vmul.f32 0.0625, %v653_v19 }
 0x6f0   :  { %v656_v21 = vsub.f32 %v649_v15, %v655_v20 }
 0x6f2   :  { %v657_v22 = vmul.f32 %v656_v21, %v656_v21 }
 0x6f4   :  { %v658_v23 = vsel %vm650_vm8, %v657_v22, 0.0 }
 0x6f5   :  { %659 = vadd.xlane.f32.xlu1 %v658_v23  ;;  %v669_v28 = vpop.permute.xlu0 %668 }
 0x706   :  { %675 = vperm.xlu1 %766, %v672_v17  }
 0x77e   :  { %v660_v14 = vpop.xlane.xlu1 %659 }
 0x77f   :  { %v661_v24 = vmul.f32 0.0625, %v660_v14 }
 0x781   :  { %v662_v25 = vadd.f32 1e-05, %v661_v24 }
 0x782   :  { %v676_v30 = vpop.permute.xlu1 %675 }
 0x783   :  { %774 = vrsqrt.f32 %v662_v25 }
 0x790   :  { %v775_v26 = vpop.eup %774 }
 0x791   :  { %v664_v27 = vmul.f32 %v775_v26, %v656_v21 }
 0x793   :  { %v671_v29 = vmul.f32 %v669_v28, %v664_v27 }
 0x795   :  { %v678_v31 = vadd.f32 %v676_v30, %v671_v29 }
 0x797   :  { %679 = vst.msk [vmem:[#allocation2] sm:$0xf] %vm650_vm8, %v678_v31 }
 0x798   :  { %787 = shalt.err (!%p784_p4)
}
 0x799   :  { %689 = dma.vmem_to_hbm [thread:$0]  %s687_s28, 64, %s982_s16, [#allocation3]  }
 0x79a   :  { %796 = dma.done.wait [#allocation3], 64  }
 0x79b   :  { %797 = vsyncadd [#allocation3], 4294967232 }
 0x79c   :  { %693 = vsyncpa [#allocation3], 1 }

</bundles_post_ra>
